<compile_context>
chip_gen: v7x
topology: tpu7x:2x2x1
jax: 0.10.0
libtpu: 0.0.40
codegen_flags: <defaults>
</compile_context>

<pallas_src>
import jax
import jax.numpy as jnp
from jax.experimental import pallas as pl
from jax.experimental.pallas import tpu as pltpu


# ---------------------------------------------------------------------------
# Hardware / heuristic helpers
# ---------------------------------------------------------------------------
_FALLBACK_VMEM_BYTES = 64 * 1024 * 1024      # v7x per-TC VMEM: safe lower bound
_FUSED_PER_LAYER_BYTES = 512 * 1024          # ~0.35us step overhead * HBM BW


def _vmem_capacity_bytes():
    """Physical VMEM of the local part (128 MiB v5e/v6e, 64 MiB v7x)."""
    try:
        info = pltpu.get_tpu_info()
        for attr in ("vmem_capacity_bytes", "vmem_bytes", "vmem_size_bytes"):
            v = getattr(info, attr, None)
            if isinstance(v, int) and v > 0:
                return v
    except Exception:
        pass
    return _FALLBACK_VMEM_BYTES


def _cost_estimate(batch, dim, layers, w_itemsize, weight_passes=1):
    return pl.CostEstimate(
        flops=2 * layers * batch * dim * dim,
        transcendentals=0,
        bytes_accessed=(
            weight_passes * layers * dim * dim * w_itemsize
            + layers * dim * 4
            + 2 * batch * dim * 4
        ),
    )


def _pick_tm(batch):
    """Batch (M) tile: MXU-native 256/128 when batch divides evenly, else whole."""
    for tm in (256, 128):
        if batch > tm and batch % tm == 0:
            return tm
    return batch


def _pick_tn(dim, fits):
    """Largest N tile (multiple of 128 dividing dim) whose buffers fit VMEM."""
    if dim % 128 != 0:
        return dim
    tn = dim
    while tn > 128 and not fits(tn):
        nxt = tn // 2
        if nxt % 128 != 0 or dim % nxt != 0:
            break
        tn = nxt
    return tn


# ---------------------------------------------------------------------------
# Fused kernel: one grid step, whole weight stack in VMEM, unrolled layers.
# ---------------------------------------------------------------------------
def mlp_fused_kernel(x_ref, w_ref, b_ref, o_ref):
    """x_ref: (B, D); w_ref: (L, D, D); b_ref: (L, 1, D) f32; o_ref: (B, D)."""
    h = x_ref[...].astype(jnp.float32)
    for layer in range(w_ref.shape[0]):          # static unroll (L compile-time)
        h = jnp.dot(h.astype(w_ref.dtype), w_ref[layer],
                    preferred_element_type=jnp.float32)
        h = jnp.maximum(h + b_ref[layer], 0.0)
    o_ref[...] = h.astype(o_ref.dtype)


# ---------------------------------------------------------------------------
# Streamed kernel: grid = (batch_tiles, layers, n_tiles).
#   x_hbm  : (B, D) in HBM (pl.ANY) — DMA'd once per batch tile at layer 0
#   w_ref  : (D, tn)  weight column slab for (layer, n), double-buffered
#   b_ref  : (1, tn)  bias slab
#   o_ref  : (tm, tn) output tile for (batch_tile, n)
#   act_cur: (tm, D)  current layer's input activations (weight dtype)
#   act_nxt: (tm, D)  next layer's input, assembled N-tile by N-tile
#   sem    : DMA semaphore for the layer-0 x load
# ---------------------------------------------------------------------------
def mlp_stream_kernel(x_hbm, w_ref, b_ref, o_ref, act_cur, act_nxt, sem):
    b = pl.program_id(0)
    layer = pl.program_id(1)
    n = pl.program_id(2)
    last_layer = pl.num_programs(1) - 1
    last_n = pl.num_programs(2) - 1
    tm, tn = o_ref.shape

    # Layer 0, first N tile of this batch tile: pull x into activation scratch.
    @pl.when(jnp.logical_and(layer == 0, n == 0))
    def _load_x():
        row0 = pl.multiple_of(b * tm, tm)
        cp = pltpu.make_async_copy(x_hbm.at[pl.ds(row0, tm), :], act_cur, sem)
        cp.start()
        cp.wait()

    acc = jnp.dot(act_cur[...].astype(w_ref.dtype), w_ref[...],
                  preferred_element_type=jnp.float32)
    out_tile = jnp.maximum(acc + b_ref[...], 0.0)          # (tm, tn) f32

    col0 = pl.multiple_of(n * tn, tn)
    act_nxt[:, pl.ds(col0, tn)] = out_tile.astype(act_nxt.dtype)

    # Unconditional store: only the last layer's values survive in HBM
    # (earlier write-backs are overwritten; negligible B*D traffic).
    o_ref[...] = out_tile.astype(o_ref.dtype)

    # Layer boundary: promote the assembled next activations to "current".
    @pl.when(jnp.logical_and(n == last_n, layer != last_layer))
    def _advance():
        act_cur[...] = act_nxt[...]


# ---------------------------------------------------------------------------
# Wrappers
# ---------------------------------------------------------------------------
def _mlp_fused(x, weights, biases):
    num_layers, dim, _ = weights.shape
    batch = x.shape[0]
    return pl.pallas_call(
        mlp_fused_kernel,
        out_shape=jax.ShapeDtypeStruct((batch, dim), x.dtype),
        cost_estimate=_cost_estimate(batch, dim, num_layers, weights.dtype.itemsize),
    )(x, weights, biases)


def _mlp_streamed(x, weights, biases, *, tm=None, tn=None):
    num_layers, dim, _ = weights.shape
    batch = x.shape[0]
    wi = weights.dtype.itemsize
    oi = x.dtype.itemsize
    phys = _vmem_capacity_bytes()

    if tm is None:
        tm = _pick_tm(batch)
    if tn is None:
        budget = int(0.6 * phys)

        def _fits(t):
            return (2 * dim * t * wi            # double-buffered weight slab
                    + 2 * tm * dim * wi         # act_cur + act_nxt
                    + 2 * tm * t * oi           # double-buffered output tile
                    + 2 * 8 * t * 4) <= budget  # bias slabs (sublane padded)
        tn = _pick_tn(dim, _fits)

    assert batch % tm == 0, f"batch={batch} not divisible by tm={tm}"
    assert dim % tn == 0, f"dim={dim} not divisible by tn={tn}"
    bt, n_tiles = batch // tm, dim // tn

    # Activations enter layer 0 in the weight dtype (same rounding the fused
    # path applies before its first dot); accumulation remains f32.
    x_in = x if x.dtype == weights.dtype else x.astype(weights.dtype)

    need = (2 * dim * tn * wi + 2 * tm * dim * wi
            + 2 * tm * tn * oi + 2 * 8 * tn * 4)
    # Explicit limit (v5e's scoped default is only 16 MiB), clamped to the
    # part's physical VMEM (64 MiB on v7x) instead of a flat 100 MiB cap.
    limit = min(int(0.85 * phys), max(int(need * 3 // 2) + (2 << 20), 32 << 20))

    return pl.pallas_call(
        mlp_stream_kernel,
        out_shape=jax.ShapeDtypeStruct((batch, dim), x.dtype),
        grid_spec=pltpu.PrefetchScalarGridSpec(
            num_scalar_prefetch=0,
            grid=(bt, num_layers, n_tiles),
            in_specs=[
                pl.BlockSpec(memory_space=pl.ANY),                  # x stays in HBM
                pl.BlockSpec((pl.Squeezed(), dim, tn), lambda b, l, n: (l, 0, n)),
                pl.BlockSpec((pl.Squeezed(), 1, tn), lambda b, l, n: (l, 0, n)),
            ],
            out_specs=pl.BlockSpec((tm, tn), lambda b, l, n: (b, n)),
            scratch_shapes=[
                pltpu.VMEM((tm, dim), weights.dtype),   # act_cur
                pltpu.VMEM((tm, dim), weights.dtype),   # act_nxt
                pltpu.SemaphoreType.DMA(()),
            ],
        ),
        compiler_params=pltpu.CompilerParams(
            # Batch tiles are independent -> shard across v7x's 2 TCs.
            # Layer / N axes carry the activation scratch -> sequential.
            dimension_semantics=("parallel", "arbitrary", "arbitrary"),
            vmem_limit_bytes=limit,
        ),
        cost_estimate=_cost_estimate(batch, dim, num_layers, wi, weight_passes=bt),
    )(x_in, weights, biases)


def mlp_forward(x, weights, biases):
    """x: (B, D); weights: (L, D, D) (ideally bf16); biases: (L, 1, D) f32."""
    num_layers, dim, _ = weights.shape
    batch = x.shape[0]
    per_layer_w = dim * dim * weights.dtype.itemsize
    total = (weights.size * weights.dtype.itemsize
             + biases.size * biases.dtype.itemsize
             + 2 * batch * dim * x.dtype.itemsize)
    fused_budget = min(6 * 1024 * 1024, _vmem_capacity_bytes() // 8)
    if per_layer_w <= _FUSED_PER_LAYER_BYTES and total <= fused_budget:
        return _mlp_fused(x, weights, biases)
    return _mlp_streamed(x, weights, biases)


# ---------------------------------------------------------------------------
# Params + reference
# ---------------------------------------------------------------------------
def init_params(key, layers, dim):
    """Deterministic init mimicking nn.Linear shapes: W_pt (out,in), b (out,)."""
    ws, bs = [], []
    bound = 1.0 / jnp.sqrt(dim)
    for i in range(layers):
        kw, kb, key = jax.random.split(jax.random.fold_in(key, i), 3)
        w_pt = jax.random.uniform(kw, (dim, dim), jnp.float32, -bound, bound)
        b = jax.random.uniform(kb, (dim,), jnp.float32, -bound, bound)
        ws.append(w_pt.T)            # store as (in_dim, out_dim)
        bs.append(b.reshape(1, dim))
    return jnp.stack(ws, axis=0), jnp.stack(bs, axis=0)


def reference_forward(x, weights, biases):
    """Plain-JAX reference using the same weight-dtype / f32-accumulate scheme."""
    h = x
    for l in range(weights.shape[0]):
        h = jnp.dot(h.astype(weights.dtype), weights[l],
                    preferred_element_type=jnp.float32)
        h = jnp.maximum(h + biases[l], 0.0)
    return h


if __name__ == "__main__":
    key = jax.random.PRNGKey(0)

    # Config 1: the shipped small DummyModel shape -> fused single-step path.
    layers, dim, batch = 3, 128, 8
    kx, kp, key = jax.random.split(key, 3)
    x = jax.random.normal(kx, (batch, dim), dtype=jnp.float32)
    w_f32, b = init_params(kp, layers, dim)
    w = w_f32.astype(jnp.bfloat16)                 # bf16 weight streaming

    ref = reference_forward(x, w, b)
    out = jax.block_until_ready(mlp_forward(x, w, b))
    assert out.shape == (batch, dim) and out.dtype == x.dtype
    assert jnp.allclose(out, ref, atol=1e-2, rtol=1e-2), "fused kernel mismatch"

    # Same model through the streamed path (grid = (1, L, 1)).
    out_s = jax.block_until_ready(_mlp_streamed(x, w, b))
    assert jnp.allclose(out_s, ref, atol=1e-2, rtol=1e-2), "streamed kernel mismatch"

    # Config 2: exercise batch tiling ("parallel" axis), N tiling and the
    # activation ping-pong: grid = (2 batch tiles, 4 layers, 2 N tiles).
    layers2, dim2, batch2 = 4, 256, 32
    kx2, kp2, key = jax.random.split(key, 3)
    x2 = jax.random.normal(kx2, (batch2, dim2), dtype=jnp.float32)
    w2, b2 = init_params(kp2, layers2, dim2)
    w2 = w2.astype(jnp.bfloat16)
    ref2 = reference_forward(x2, w2, b2)
    out2 = jax.block_until_ready(_mlp_streamed(x2, w2, b2, tm=16, tn=128))
    assert out2.shape == (batch2, dim2)
    assert jnp.allclose(out2, ref2, atol=1e-2, rtol=1e-2), "tiled streamed mismatch"

    print("KERNEL_OK")
</pallas_src>

<mosaic_0001>
module attributes {stable_mosaic.version = 11 : i64} {
  func.func @mlp_fused_kernel(%arg0: memref<8x128xf32, #tpu.memory_space<vmem>>, %arg1: memref<3x128x128xbf16, #tpu.memory_space<vmem>>, %arg2: memref<3x1x128xf32, #tpu.memory_space<vmem>>, %arg3: memref<8x128xf32, #tpu.memory_space<vmem>>) attributes {dimension_semantics = [], scalar_prefetch = 0 : i64, scratch_operands = 0 : i64, tpu.core_type = #tpu.core_type<tc>} {
    %c0 = arith.constant 0 : index
    %c0_0 = arith.constant 0 : index
    %0 = vector.load %arg0[%c0, %c0_0] : memref<8x128xf32, #tpu.memory_space<vmem>>, vector<8x128xf32>
    %1 = arith.truncf %0 : vector<8x128xf32> to vector<8x128xbf16>
    %c0_1 = arith.constant 0 : index
    %c0_2 = arith.constant 0 : index
    %c0_3 = arith.constant 0 : index
    %2 = vector.load %arg1[%c0_1, %c0_2, %c0_3] : memref<3x128x128xbf16, #tpu.memory_space<vmem>>, vector<1x128x128xbf16>
    %3 = vector.shape_cast %2 : vector<1x128x128xbf16> to vector<128x128xbf16>
    %cst = arith.constant dense<0.000000e+00> : vector<8x128xf32>
    %4 = tpu.matmul %1, %3, %cst {dimension_numbers = #tpu.dot_dimension_numbers<[1], [0], [0], [1], [0, 0, 1, 1], [], []>} : vector<8x128xbf16>, vector<128x128xbf16>, vector<8x128xf32> -> vector<8x128xf32>
    %c0_4 = arith.constant 0 : index
    %c0_5 = arith.constant 0 : index
    %c0_6 = arith.constant 0 : index
    %5 = vector.load %arg2[%c0_4, %c0_5, %c0_6] : memref<3x1x128xf32, #tpu.memory_space<vmem>>, vector<1x1x128xf32>
    %6 = vector.shape_cast %5 : vector<1x1x128xf32> to vector<1x128xf32>
    %7 = vector.broadcast %6 : vector<1x128xf32> to vector<8x128xf32>
    %8 = arith.addf %4, %7 : vector<8x128xf32>
    %cst_7 = arith.constant 0.000000e+00 : f32
    %9 = vector.broadcast %cst_7 : f32 to vector<8x128xf32>
    %10 = arith.maximumf %8, %9 : vector<8x128xf32>
    %11 = arith.truncf %10 : vector<8x128xf32> to vector<8x128xbf16>
    %c1 = arith.constant 1 : index
    %c0_8 = arith.constant 0 : index
    %c0_9 = arith.constant 0 : index
    %12 = vector.load %arg1[%c1, %c0_8, %c0_9] : memref<3x128x128xbf16, #tpu.memory_space<vmem>>, vector<1x128x128xbf16>
    %13 = vector.shape_cast %12 : vector<1x128x128xbf16> to vector<128x128xbf16>
    %cst_10 = arith.constant dense<0.000000e+00> : vector<8x128xf32>
    %14 = tpu.matmul %11, %13, %cst_10 {dimension_numbers = #tpu.dot_dimension_numbers<[1], [0], [0], [1], [0, 0, 1, 1], [], []>} : vector<8x128xbf16>, vector<128x128xbf16>, vector<8x128xf32> -> vector<8x128xf32>
    %c1_11 = arith.constant 1 : index
    %c0_12 = arith.constant 0 : index
    %c0_13 = arith.constant 0 : index
    %15 = vector.load %arg2[%c1_11, %c0_12, %c0_13] : memref<3x1x128xf32, #tpu.memory_space<vmem>>, vector<1x1x128xf32>
    %16 = vector.shape_cast %15 : vector<1x1x128xf32> to vector<1x128xf32>
    %17 = vector.broadcast %16 : vector<1x128xf32> to vector<8x128xf32>
    %18 = arith.addf %14, %17 : vector<8x128xf32>
    %cst_14 = arith.constant 0.000000e+00 : f32
    %19 = vector.broadcast %cst_14 : f32 to vector<8x128xf32>
    %20 = arith.maximumf %18, %19 : vector<8x128xf32>
    %21 = arith.truncf %20 : vector<8x128xf32> to vector<8x128xbf16>
    %c2 = arith.constant 2 : index
    %c0_15 = arith.constant 0 : index
    %c0_16 = arith.constant 0 : index
    %22 = vector.load %arg1[%c2, %c0_15, %c0_16] : memref<3x128x128xbf16, #tpu.memory_space<vmem>>, vector<1x128x128xbf16>
    %23 = vector.shape_cast %22 : vector<1x128x128xbf16> to vector<128x128xbf16>
    %cst_17 = arith.constant dense<0.000000e+00> : vector<8x128xf32>
    %24 = tpu.matmul %21, %23, %cst_17 {dimension_numbers = #tpu.dot_dimension_numbers<[1], [0], [0], [1], [0, 0, 1, 1], [], []>} : vector<8x128xbf16>, vector<128x128xbf16>, vector<8x128xf32> -> vector<8x128xf32>
    %c2_18 = arith.constant 2 : index
    %c0_19 = arith.constant 0 : index
    %c0_20 = arith.constant 0 : index
    %25 = vector.load %arg2[%c2_18, %c0_19, %c0_20] : memref<3x1x128xf32, #tpu.memory_space<vmem>>, vector<1x1x128xf32>
    %26 = vector.shape_cast %25 : vector<1x1x128xf32> to vector<1x128xf32>
    %27 = vector.broadcast %26 : vector<1x128xf32> to vector<8x128xf32>
    %28 = arith.addf %24, %27 : vector<8x128xf32>
    %cst_21 = arith.constant 0.000000e+00 : f32
    %29 = vector.broadcast %cst_21 : f32 to vector<8x128xf32>
    %30 = arith.maximumf %28, %29 : vector<8x128xf32>
    %c0_22 = arith.constant 0 : index
    %c0_23 = arith.constant 0 : index
    %31 = vector.load %arg3[%c0_22, %c0_23] : memref<8x128xf32, #tpu.memory_space<vmem>>, vector<8x128xf32>
    tpu.vector_store %arg3[%c0_22, %c0_23], %30 {strides = array<i32>} : memref<8x128xf32, #tpu.memory_space<vmem>>, vector<8x128xf32>,
    return
  }
}

</mosaic_0001>

<bundles_post_ra>
// kernel: tpu_custom_call.1
= control target key start
LH: loop header
LB: loop body
LE: loop exit
PB: predicated region body
PF: predicated region fallthrough
CT: control target
= control target key end

     0   :  { %8 = vsyncpa [#allocation3], 0  ;;  %s731_s0 = inlined_call_operand.hbm [shape: f32[8,128], index: 0, kind: input, shape index: {}]   ;;  %s732_s1 = inlined_call_operand.hbm [shape: bf16[3,128,128], index: 1, kind: input, shape index: {}]   ;;  %s733_s2 = inlined_call_operand.vmem [shape: f32[3,1,128], index: 2, kind: input, shape index: {}]   ;;  %s734_s3 = inlined_call_operand.hbm [shape: f32[8,128], index: 3, kind: output, shape index: {}]  }
   0x1   :  { %9 = vsyncpa [#allocation6], 0 }
   0x2   :  { %10 = vsyncpa [#allocation4], 0  ;;  %s622_s12 = smov [#allocation2]   ;;  %s623_s14 = smov [#allocation5]  }
   0x3   :  { %s17_s13 = sshll.u32 %s622_s12, 4  ;;  %s26_s15 = sshll.u32 %s623_s14, 4  ;;  %s18_s13 = int_to_ptr.vmem [resolvable:$true] %s17_s13  ;;  %s649_s15 = int_to_ptr.vmem [resolvable:$true] %s26_s15 }
   0x4   :  { %s550_s18 = scalar_lea.hbm %s731_s0, 128 }
   0x5   :  { %p551_p0 = scmp.ne.s32.totalorder %s731_s0, %s550_s18  ;;  %p554_p1 = scmp.lt.u32.totalorder %s550_s18, %s731_s0 }
   0x7   :  { %p556_p2 = pnand %p554_p1, %p551_p0 }
   0x9   :  { %559 = shalt.err (!%p556_p2)
}
   0xa   :  { %s560_s23 = scalar_lea.vmem %s18_s13, 128  ;;  %p565_p4 = scmp.lt.s32.totalorder %s18_s13, %s18_s13 }
   0xb   :  { %p561_p3 = scmp.ne.s32.totalorder %s18_s13, %s560_s23  ;;  %p566_p5 = scmp.lt.s32.totalorder %s560_s23, %s560_s23 }
   0xd   :  { %p567_p6 = por %p566_p5, %p565_p4 }
   0xf   :  { %p568_p7 = pnand %p567_p6, %p561_p3 }
  0x11   :  { %571 = shalt.err (!%p568_p7)
}
  0x12   :  { %20 = dma.hbm_to_vmem [thread:$0]  %s731_s0, 128, %s18_s13, [#allocation3]  }
  0x13   :  { %s572_s28 = scalar_lea.hbm %s732_s1, 3072 }
  0x14   :  { %p573_p8 = scmp.ne.s32.totalorder %s732_s1, %s572_s28  ;;  %p576_p9 = scmp.lt.u32.totalorder %s572_s28, %s732_s1 }
  0x16   :  { %p578_p10 = pnand %p576_p9, %p573_p8 }
  0x18   :  { %581 = shalt.err (!%p578_p10)
}
  0x19   :  { %s582_s6 = scalar_lea.vmem %s649_s15, 3072  ;;  %p587_p12 = scmp.lt.s32.totalorder %s649_s15, %s649_s15 }
  0x1a   :  { %p583_p11 = scmp.ne.s32.totalorder %s649_s15, %s582_s6  ;;  %p588_p13 = scmp.lt.s32.totalorder %s582_s6, %s582_s6 }
  0x1c   :  { %p589_p0 = por %p588_p13, %p587_p12 }
  0x1e   :  { %p590_p1 = pnand %p589_p0, %p583_p11 }
  0x20   :  { %593 = shalt.err (!%p590_p1)
}
  0x21   :  { %s624_s0 = smov 64   ;;  %s625_s7 = smov 4  }
  0x22   :  { %32 = dma.hbm_to_vmem [thread:$0]  %s732_s1, 3072, %s649_s15, [#allocation6], %s624_s0, %s624_s0, %s625_s7  }
  0x23   :  { %616 = dma.done.wait [#allocation3], 128  }
  0x24   :  { %617 = vsyncadd [#allocation3], 4294967168 }
  0x25   :  { %618 = dma.done.wait [#allocation6], 3072  }
  0x26   :  { %619 = vsyncadd [#allocation6], 4294964224  ;;  %v626_v0 = vmov 0.0   ;;  %vm627_vm0 = vmmov 0   ;;  %v526_v1 = vld [vmem:[#allocation5] sm:$0xff]   ;;  %v527_v2 = vld [vmem:[#allocation5 + $0x8] sm:$0xff]  }
  0x27   :  { %459 = vmatprep.subr.bf16.mxu0 %v626_v0  ;;  %475 = vmatprep.mubr.msk.bf16.mxu0 %vm627_vm0, %v626_v0  ;;  %v528_v3 = vld [vmem:[#allocation5 + $0x10] sm:$0xff]   ;;  %v534_v4 = vld [vmem:[#allocation5 + $0x40] sm:$0xff]   ;;  %v529_v5 = vld [vmem:[#allocation5 + $0x18] sm:$0xff]   ;;  %s628_s15 = smov [#allocation7]  }
  0x28   :  { %479 = vmatprep.subr.bf16.mxu1 %v626_v0  ;;  %495 = vmatprep.mubr.msk.bf16.mxu1 %vm627_vm0, %v626_v0  ;;  %v535_v6 = vld [vmem:[#allocation5 + $0x48] sm:$0xff]   ;;  %v530_v7 = vld [vmem:[#allocation5 + $0x20] sm:$0xff]   ;;  %v536_v8 = vld [vmem:[#allocation5 + $0x50] sm:$0xff]   ;;  %s393_s16 = sshll.u32 %s628_s15, 4  ;;  %s394_s16 = int_to_ptr.vmem [resolvable:$true] %s393_s16 }
  0x29   :  { %460 = vmatpush3.bf16.msra.mxu0 %v526_v1  ;;  %480 = vmatpush3.bf16.msra.mxu1 %v534_v4  ;;  %v531_v9 = vld [vmem:[#allocation5 + $0x28] sm:$0xff]   ;;  %v537_v10 = vld [vmem:[#allocation5 + $0x58] sm:$0xff]   ;;  %v532_v11 = vld [vmem:[#allocation5 + $0x30] sm:$0xff]   ;;  %s594_s17 = scalar_lea.vmem %s394_s16, 128  ;;  %p599_p3 = scmp.lt.s32.totalorder %s394_s16, %s394_s16 }
  0x2a   :  { %461 = vmatprep.subr.bf16.mxu0 %v626_v0  ;;  %481 = vmatprep.subr.bf16.mxu1 %v626_v0  ;;  %v538_v12 = vld [vmem:[#allocation5 + $0x60] sm:$0xff]   ;;  %v533_v13 = vld [vmem:[#allocation5 + $0x38] sm:$0xff]   ;;  %v539_v15 = vld [vmem:[#allocation5 + $0x68] sm:$0xff]   ;;  %p595_p2 = scmp.ne.s32.totalorder %s394_s16, %s594_s17  ;;  %p600_p4 = scmp.lt.s32.totalorder %s594_s17, %s594_s17 }
  0x2b   :  { %v42_v14 = vld [vmem:[#allocation2] sm:$0xff]  ;;  %v540_v17 = vld [vmem:[#allocation5 + $0x70] sm:$0xff]   ;;  %v542_v19 = vld [vmem:[#allocation5 + $0x80] sm:$0xff]  }
  0x2c   :  { %v43_v16 = vpack.c.bf16 %v42_v14, %v42_v14  ;;  %v541_v18 = vld [vmem:[#allocation5 + $0x78] sm:$0xff]   ;;  %v543_v20 = vld [vmem:[#allocation5 + $0x88] sm:$0xff]   ;;  %v544_v21 = vld [vmem:[#allocation5 + $0x90] sm:$0xff]   ;;  %p601_p5 = por %p600_p4, %p599_p3 }
  0x2d   :  { %462 = vmatpush3.bf16.msra.mxu0 %v527_v2  ;;  %482 = vmatpush3.bf16.msra.mxu1 %v535_v6  ;;  %v545_v22 = vld [vmem:[#allocation5 + $0x98] sm:$0xff]   ;;  %v546_v23 = vld [vmem:[#allocation5 + $0xa0] sm:$0xff]   ;;  %v547_v24 = vld [vmem:[#allocation5 + $0xa8] sm:$0xff]  }
  0x2e   :  { %463 = vmatprep.subr.bf16.mxu0 %v626_v0  ;;  %483 = vmatprep.subr.bf16.mxu1 %v626_v0  ;;  %v403_v25 = vld [vmem:[%s733_s2] ss:$0 sm:$0xff]  ;;  %v548_v33 = vld [vmem:[#allocation5 + $0xb0] sm:$0xff]   ;;  %v413_v35 = vld [vmem:[%s733_s2 + $0x1] ss:$0 sm:$0xff]  ;;  %p602_p6 = pnand %p601_p5, %p595_p2 }
  0x2f   :  { %v549_v34 = vld [vmem:[#allocation5 + $0xb8] sm:$0xff]  }
  0x30   :  { %v423_v43 = vld [vmem:[%s733_s2 + $0x2] ss:$0 sm:$0xff] }
  0x31   :  { %464 = vmatpush3.bf16.msra.mxu0 %v528_v3  ;;  %484 = vmatpush3.bf16.msra.mxu1 %v536_v8 }
  0x32   :  { %465 = vmatprep.subr.bf16.mxu0 %v626_v0  ;;  %485 = vmatprep.subr.bf16.mxu1 %v626_v0 }
  0x35   :  { %466 = vmatpush3.bf16.msra.mxu0 %v529_v5  ;;  %486 = vmatpush3.bf16.msra.mxu1 %v537_v10 }
  0x36   :  { %467 = vmatprep.subr.bf16.mxu0 %v626_v0  ;;  %487 = vmatprep.subr.bf16.mxu1 %v626_v0 }
  0x39   :  { %468 = vmatpush3.bf16.msra.mxu0 %v530_v7  ;;  %488 = vmatpush3.bf16.msra.mxu1 %v538_v12 }
  0x3a   :  { %469 = vmatprep.subr.bf16.mxu0 %v626_v0  ;;  %489 = vmatprep.subr.bf16.mxu1 %v626_v0 }
  0x3d   :  { %470 = vmatpush3.bf16.msra.mxu0 %v531_v9  ;;  %490 = vmatpush3.bf16.msra.mxu1 %v539_v15 }
  0x3e   :  { %471 = vmatprep.subr.bf16.mxu0 %v626_v0  ;;  %491 = vmatprep.subr.bf16.mxu1 %v626_v0 }
  0x41   :  { %472 = vmatpush3.bf16.msra.mxu0 %v532_v11  ;;  %492 = vmatpush3.bf16.msra.mxu1 %v540_v17 }
  0x42   :  { %473 = vmatprep.subr.bf16.mxu0 %v626_v0  ;;  %493 = vmatprep.subr.bf16.mxu1 %v626_v0 }
  0x45   :  { %474 = vmatpush3.bf16.msra.mxu0 %v533_v13  ;;  %494 = vmatpush3.bf16.msra.mxu1 %v541_v18 }
  0x46   :  { %499 = vmatprep.subr.bf16.mxu0 %v626_v0 }
  0x48   :  { %476 = vmatmul.mubr.bf16.vlgmr.msra.gmra.mrb[0].mxu0 %v43_v16 }
  0x49   :  { %515 = vmatprep.mubr.msk.bf16.mxu0 %vm627_vm0, %v626_v0  ;;  %500 = vmatpush3.bf16.msra.mxu0 %v542_v19 }
  0x4a   :  { %501 = vmatprep.subr.bf16.mxu0 %v626_v0 }
  0x4d   :  { %502 = vmatpush3.bf16.msra.mxu0 %v543_v20 }
  0x4e   :  { %503 = vmatprep.subr.bf16.mxu0 %v626_v0 }
  0x51   :  { %504 = vmatpush3.bf16.msra.mxu0 %v544_v21 }
  0x52   :  { %505 = vmatprep.subr.bf16.mxu0 %v626_v0 }
  0x55   :  { %506 = vmatpush3.bf16.msra.mxu0 %v545_v22 }
  0x56   :  { %507 = vmatprep.subr.bf16.mxu0 %v626_v0 }
  0x59   :  { %508 = vmatpush3.bf16.msra.mxu0 %v546_v23 }
  0x5a   :  { %509 = vmatprep.subr.bf16.mxu0 %v626_v0 }
  0x5d   :  { %510 = vmatpush3.bf16.msra.mxu0 %v547_v24 }
  0x5e   :  { %511 = vmatprep.subr.bf16.mxu0 %v626_v0 }
  0x61   :  { %512 = vmatpush3.bf16.msra.mxu0 %v548_v33 }
  0x62   :  { %513 = vmatprep.subr.bf16.mxu0 %v626_v0 }
  0x65   :  { %514 = vmatpush3.bf16.msra.mxu0 %v549_v34 }
 0x11b   :  { %v149_v26 = vpop.f32.mrb[0].mxu0 }
 0x11c   :  { %v150_v27 = vadd.f32 %v403_v25, %v149_v26  ;;  %v477_v28 = vpop.f32.mrb[1].mxu0 }
 0x11d   :  { %v152_v29 = vpop.f32.mrb[2].mxu0 }
 0x11e   :  { %v155_v30 = vmax.f32 %v150_v27, 0.0  ;;  %v478_v31 = vpop.f32.mrb[3].mxu0 }
 0x120   :  { %v156_v32 = vpack.c.bf16 %v155_v30, %v155_v30 }
 0x122   :  { %496 = vmatmul.mubr.bf16.vlgmr.msra.gmra.mrb[0].mxu1 %v156_v32 }
 0x1f5   :  { %v264_v36 = vpop.f32.mrb[0].mxu1 }
 0x1f6   :  { %v265_v37 = vadd.f32 %v413_v35, %v264_v36  ;;  %v497_v38 = vpop.f32.mrb[1].mxu1 }
 0x1f7   :  { %v267_v39 = vpop.f32.mrb[2].mxu1 }
 0x1f8   :  { %v270_v40 = vmax.f32 %v265_v37, 0.0  ;;  %v498_v41 = vpop.f32.mrb[3].mxu1 }
 0x1fa   :  { %v271_v42 = vpack.c.bf16 %v270_v40, %v270_v40 }
 0x1fc   :  { %516 = vmatmul.mubr.bf16.vlgmr.msra.gmra.mrb[4].mxu0 %v271_v42 }
 0x2cf   :  { %v379_v44 = vpop.f32.mrb[4].mxu0 }
 0x2d0   :  { %v380_v45 = vadd.f32 %v423_v43, %v379_v44  ;;  %v517_v46 = vpop.f32.mrb[5].mxu0 }
 0x2d1   :  { %v382_v47 = vpop.f32.mrb[6].mxu0 }
 0x2d2   :  { %v385_v48 = vmax.f32 %v380_v45, 0.0  ;;  %v518_v49 = vpop.f32.mrb[7].mxu0 }
 0x2d4   :  { %386 = vst [vmem:[#allocation7] sm:$0xff] %v385_v48 }
 0x2d5   :  { %605 = shalt.err (!%p602_p6)
}
 0x2d6   :  { %s606_s2 = scalar_lea.hbm %s734_s3, 128 }
 0x2d7   :  { %p607_p7 = scmp.ne.s32.totalorder %s734_s3, %s606_s2  ;;  %p610_p8 = scmp.lt.u32.totalorder %s606_s2, %s734_s3 }
 0x2d9   :  { %p612_p9 = pnand %p610_p8, %p607_p7 }
 0x2db   :  { %615 = shalt.err (!%p612_p9)
}
 0x2dc   :  { %396 = dma.vmem_to_hbm [thread:$0]  %s394_s16, 128, %s734_s3, [#allocation4]  }
 0x2dd   :  { %620 = dma.done.wait [#allocation4], 128  }
 0x2de   :  { %621 = vsyncadd [#allocation4], 4294967168 }
 0x2df   :  { %400 = vsyncpa [#allocation3], 1 }
 0x2e0   :  { %401 = vsyncpa [#allocation6], 1 }
 0x2e1   :  { %402 = vsyncpa [#allocation4], 1 }

</bundles_post_ra>
